<compile_context>
chip_gen: v5e
topology: v5e:2x2
jax: 0.10.0
libtpu: 0.0.40
codegen_flags: <defaults>
</compile_context>

<pallas_src>
import functools

import jax
import jax.numpy as jnp
from jax.experimental import pallas as pl
from jax.experimental.pallas import tpu as pltpu

_LANES = 128


def _laplace_act_kernel(x_ref, o_ref, *, inv_sigma):
    # Load in native dtype, compute in f32 (native VPU/EUP path on all gens),
    # store back in native dtype.
    x = x_ref[...].astype(jnp.float32)
    exp_branch = jnp.exp(x * inv_sigma)          # == exp(-|x|/sigma) when x < 0
    y = jnp.where(x < 0.0, exp_branch, x)        # select, never an arithmetic blend
    o_ref[...] = y.astype(o_ref.dtype)


def modified_laplace_activation(x, sigma=1.0, *, tile_rows=4096):
    """Elementwise ModifiedLaplaceActivation. Accepts any shape / float dtype."""
    orig_shape = x.shape
    orig_dtype = x.dtype
    n = x.size

    # Flatten to (rows, 128). Only pad the lane remainder (< 128 elems) if needed;
    # typical conv shapes (C*H*W multiple of 128) skip padding entirely.
    x_flat = jnp.ravel(x)
    rem = n % _LANES
    if rem:
        x_flat = jnp.pad(x_flat, (0, _LANES - rem))
    rows = x_flat.size // _LANES
    x2d = x_flat.reshape(rows, _LANES)

    # Block: up to tile_rows x 128 (~2 MiB f32 / ~1 MiB bf16). If the whole slab
    # is smaller than one tile, use the full extent (always a legal block shape).
    tile = min(int(tile_rows), rows)
    grid = (pl.cdiv(rows, tile),)

    kernel = functools.partial(_laplace_act_kernel, inv_sigma=1.0 / float(sigma))

    out2d = pl.pallas_call(
        kernel,
        out_shape=jax.ShapeDtypeStruct((rows, _LANES), orig_dtype),
        grid_spec=pltpu.PrefetchScalarGridSpec(
            num_scalar_prefetch=0,
            grid=grid,
            in_specs=[pl.BlockSpec((tile, _LANES), lambda i: (i, 0))],
            out_specs=pl.BlockSpec((tile, _LANES), lambda i: (i, 0)),
        ),
        compiler_params=pltpu.CompilerParams(
            # Independent blocks -> shard across the 2 TensorCores on v7x.
            dimension_semantics=("parallel",),
        ),
    )(x2d)

    out_flat = out2d.reshape(-1)
    if rem:
        out_flat = out_flat[:n]
    return out_flat.reshape(orig_shape)


def _reference(x, sigma=1.0):
    neg = (x < 0).astype(x.dtype)
    pos = 1.0 - neg
    return pos * x + neg * jnp.exp(-jnp.abs(x) / sigma)


if __name__ == "__main__":
    key = jax.random.PRNGKey(0)
    # Small NCHW input consistent with typical conv-activation use.
    x = jax.random.normal(key, (2, 4, 16, 16), dtype=jnp.float32)

    sigma = 1.0
    out = modified_laplace_activation(x, sigma=sigma)
    out = jax.block_until_ready(out)

    ref = _reference(x, sigma=sigma)
    assert out.shape == x.shape and out.dtype == x.dtype
    assert jnp.allclose(out, ref, atol=1e-6, rtol=1e-6), "mismatch vs reference"

    print("KERNEL_OK")
</pallas_src>

<mosaic_0001>
module attributes {stable_mosaic.version = 11 : i64} {
  func.func @_laplace_act_kernel(%arg0: i32, %arg1: memref<16x128xf32, #tpu.memory_space<vmem>>, %arg2: memref<16x128xf32, #tpu.memory_space<vmem>>) attributes {dimension_semantics = [#tpu.dimension_semantics<parallel>], iteration_bounds = array<i64: 1>, scalar_prefetch = 0 : i64, scratch_operands = 0 : i64, tpu.core_type = #tpu.core_type<tc>, window_params = [{transform_indices = @transform_0, window_bounds = array<i64: 16, 128>}, {transform_indices = @transform_1, window_bounds = array<i64: 16, 128>}]} {
    %c0 = arith.constant 0 : index
    %c0_0 = arith.constant 0 : index
    %0 = vector.load %arg1[%c0, %c0_0] : memref<16x128xf32, #tpu.memory_space<vmem>>, vector<16x128xf32>
    %cst = arith.constant 1.000000e+00 : f32
    %1 = vector.broadcast %cst : f32 to vector<16x128xf32>
    %2 = arith.mulf %0, %1 : vector<16x128xf32>
    %3 = math.exp %2 : vector<16x128xf32>
    %cst_1 = arith.constant 0.000000e+00 : f32
    %4 = vector.broadcast %cst_1 : f32 to vector<16x128xf32>
    %5 = arith.cmpf olt, %0, %4 : vector<16x128xf32>
    %6 = arith.select %5, %3, %0 : vector<16x128xi1>, vector<16x128xf32>
    %c0_2 = arith.constant 0 : index
    %c0_3 = arith.constant 0 : index
    %7 = vector.load %arg2[%c0_2, %c0_3] : memref<16x128xf32, #tpu.memory_space<vmem>>, vector<16x128xf32>
    tpu.vector_store %arg2[%c0_2, %c0_3], %6 {strides = array<i32>} : memref<16x128xf32, #tpu.memory_space<vmem>>, vector<16x128xf32>,
    return
  }
  func.func @transform_0(%arg0: i32) -> (i32, i32) {
    %c0_i32 = arith.constant 0 : i32
    %c0_i32_0 = arith.constant 0 : i32
    return %arg0, %c0_i32 : i32, i32
  }
  func.func @transform_1(%arg0: i32) -> (i32, i32) {
    %c0_i32 = arith.constant 0 : i32
    %c0_i32_0 = arith.constant 0 : i32
    return %arg0, %c0_i32 : i32, i32
  }
}

</mosaic_0001>

<bundles_post_ra>
// kernel: tpu_custom_call.1
= control target key start
LH: loop header
LB: loop body
LE: loop exit
PB: predicated region body
PF: predicated region fallthrough
CT: control target
= control target key end

     0   :  { %6 = vsyncpa [#allocation3], 0  ;;  %s136_s0 = inlined_call_operand.hbm [shape: f32[16,128], index: 0, kind: input, shape index: {}]   ;;  %s137_s1 = inlined_call_operand.hbm [shape: f32[16,128], index: 1, kind: output, shape index: {}]  }
   0x1   :  { %7 = vsyncpa [#allocation4], 0  ;;  %s12_s8 = sshll.u32 %s136_s0, 4  ;;  %s116_s9 = smov [#allocation2]   ;;  %s13_s8 = int_to_ptr.hbm [resolvable:$true] %s12_s8 }
   0x2   :  { %s14_s10 = sshll.u32 %s116_s9, 4  ;;  %s117_s11 = smov 128   ;;  %s15_s10 = int_to_ptr.vmem [resolvable:$true] %s14_s10 }
   0x3   :  { %s118_s12 = smov 8  }
   0x4   :  { %20 = dma.hbm_to_vmem [thread:$0]  %s13_s8, 256, %s15_s10, [#allocation3], %s117_s11, %s117_s11, %s118_s12  }
   0x5   :  { %112 = dma.done.wait [#allocation3], 256  }
   0x6   :  { %113 = vsyncadd [#allocation3], 4294967040  ;;  %v25_v0 = vld [vmem:[#allocation2] sm:$0xff]  ;;  %v26_v1 = vld [vmem:[#allocation2 + $0x8] sm:$0xff]  ;;  %s119_s13 = smov [#allocation5]   ;;  %s43_s16 = sshll.u32 %s137_s1, 4  ;;  %s44_s16 = int_to_ptr.hbm [resolvable:$true] %s43_s16 }
   0x7   :  { %v27_v2 = vmul.f32 1.442695, %v25_v0  ;;  %v29_v3 = vmul.f32 1.442695, %v26_v1  ;;  %vm31_vm0 = vcmp.lt.f32.partialorder %v25_v0, 0.0  ;;  %s41_s14 = sshll.u32 %s119_s13, 4  ;;  %s42_s14 = int_to_ptr.vmem [resolvable:$true] %s41_s14 }
   0x8   :  { %vm32_vm1 = vcmp.lt.f32.partialorder %v26_v1, 0.0 }
   0x9   :  { %60 = vpow2.f32 %v27_v2 }
   0xa   :  { %62 = vpow2.f32 %v29_v3 }
   0xf   :  { %v61_v4 = vpop.eup %60 }
  0x10   :  { %v63_v5 = vpop.eup %62  ;;  %v33_v6 = vsel %vm31_vm0, %v61_v4, %v25_v0 }
  0x11   :  { %35 = vst [vmem:[#allocation5] sm:$0xff] %v33_v6  ;;  %v34_v7 = vsel %vm32_vm1, %v63_v5, %v26_v1 }
  0x12   :  { %36 = vst [vmem:[#allocation5 + $0x8] sm:$0xff] %v34_v7 }
  0x13   :  { %49 = dma.vmem_to_hbm [thread:$0]  %s42_s14, 256, %s44_s16, [#allocation4], %s117_s11, %s117_s11, %s118_s12  }
  0x14   :  { %114 = dma.done.wait [#allocation4], 256  }
  0x15   :  { %115 = vsyncadd [#allocation4], 4294967040 }
  0x16   :  { %54 = vsyncpa [#allocation3], 1 }
  0x17   :  { %55 = vsyncpa [#allocation4], 1 }

</bundles_post_ra>
